<compile_context>
chip_gen: v7x
topology: tpu7x:2x2x1
jax: 0.10.0
libtpu: 0.0.40
codegen_flags: <defaults>
</compile_context>

<pallas_src>
import jax
import jax.numpy as jnp
from jax.experimental import pallas as pl
from jax.experimental.pallas import tpu as pltpu


def _cat3_view_tanh_kernel(xt_ref, ot_ref):
    """Fused concat([x,x,x], dim=1) -> view(b, 6) -> tanh, on transposed tiles.

    xt_ref: (f, tl)   lane-dense input tile  (batch on the lane axis)
    ot_ref: (3f, tl)  lane-dense output tile

    tanh once in f32 (EUP), replicate along the sublane axis (cheap, no lane
    shifts or masked stores), single full-block store.
    """
    y = jnp.tanh(xt_ref[...].astype(jnp.float32))   # (f, tl), f32 compute
    # TODO(synk): on v6e/v7x a bf16 tanh path would halve vreg traffic; kept
    # f32 everywhere for portability (v5e VPU/EUP have no bf16 path).
    y3 = jnp.concatenate([y, y, y], axis=0)          # sublane replication -> (3f, tl)
    ot_ref[...] = y3.astype(ot_ref.dtype)            # one unmasked full-tile store


def model_forward(x: jax.Array, *, force_pallas: bool = False) -> jax.Array:
    """JAX/Pallas equivalent of Model.forward."""
    assert x.ndim == 2, "expected (batch, features) input"
    b, f = x.shape
    # The PyTorch .view(batch, 6) is only legal when 3*f == 6.
    assert 3 * f == 6, "forward requires exactly 2 elements per batch row"
    out_f = 3 * f

    # Tiny-batch bypass: kernel launch + DMA setup + pipeline prologue cost
    # orders of magnitude more than the nanoseconds of EUP work here; a fused
    # XLA elementwise op is strictly faster until the output is ~64K elements.
    if not force_pallas and b * out_f < (1 << 16):
        return jnp.tanh(jnp.tile(x, (1, 3)))

    # Lane-dense layout: batch -> lane (last) axis.
    xt = x.T                                   # (f, b)

    # Lane-tile selection:
    #  * b <= MAX_TL: full batch in ONE grid step (v5e/v6e grid is a serial
    #    loop; extra steps are pure per-step overhead).
    #  * b  > MAX_TL: MAX_TL-wide tiles (multiple of 128) -> >=2 "parallel"
    #    grid steps so v7x can shard the batch axis across its 2 TensorCores.
    #  Double-buffered f32 tiles at MAX_TL: (2+6)*4B*8192*2 = 512 KiB.
    MAX_TL = 8192
    tl = b if b <= MAX_TL else MAX_TL
    grid = (pl.cdiv(b, tl),)

    itemsize = jnp.dtype(x.dtype).itemsize
    cost = pl.CostEstimate(
        flops=0,
        transcendentals=b * f,
        bytes_accessed=b * f * itemsize + b * out_f * itemsize,
    )

    out_t = pl.pallas_call(
        _cat3_view_tanh_kernel,
        out_shape=jax.ShapeDtypeStruct((out_f, b), x.dtype),
        grid=grid,
        in_specs=[
            pl.BlockSpec((f, tl), lambda i: (0, i),
                         memory_space=pltpu.MemorySpace.VMEM),
        ],
        out_specs=pl.BlockSpec((out_f, tl), lambda i: (0, i),
                               memory_space=pltpu.MemorySpace.VMEM),
        compiler_params=pltpu.CompilerParams(
            dimension_semantics=("parallel",)),
        cost_estimate=cost,
    )(xt)

    # TODO(synk): if the caller can consume the (6, batch) layout directly,
    # skip this transpose and keep everything lane-dense end-to-end.
    return out_t.T


def _reference(x: jax.Array) -> jax.Array:
    """Pure-JAX reference mirroring the PyTorch code path."""
    xc = jnp.concatenate([x, x, x], axis=1)
    xc = xc.reshape(xc.shape[0], 6)
    return jnp.tanh(xc)


if __name__ == "__main__":
    key = jax.random.PRNGKey(0)
    k1, k2 = jax.random.split(key)

    # batch=2, features=2 (the only per-row size for which the module's
    # view(batch, 6) is well-defined).
    x_small = jax.random.normal(k1, (2, 2), dtype=jnp.float32)
    x_big = jax.random.normal(k2, (512, 2), dtype=jnp.float32)

    # Auto path for the canonical tiny input (takes the fused-XLA bypass).
    out_auto = jax.block_until_ready(model_forward(x_small))
    # Pallas kernel path, forced so the kernel itself is exercised here.
    out_small = jax.block_until_ready(model_forward(x_small, force_pallas=True))
    out_big = jax.block_until_ready(model_forward(x_big, force_pallas=True))

    ref_small = _reference(x_small)
    ref_big = _reference(x_big)

    assert out_auto.shape == (2, 6)
    assert out_small.shape == (2, 6)
    assert out_big.shape == (512, 6)
    assert jnp.allclose(out_auto, ref_small, atol=1e-6, rtol=1e-6)
    assert jnp.allclose(out_small, ref_small, atol=1e-6, rtol=1e-6)
    assert jnp.allclose(out_big, ref_big, atol=1e-6, rtol=1e-6)

    print("KERNEL_OK")
</pallas_src>

<mosaic_0001>
module attributes {stable_mosaic.version = 11 : i64} {
  func.func @_cat3_view_tanh_kernel(%arg0: i32, %arg1: memref<2x2xf32, #tpu.memory_space<vmem>>, %arg2: memref<6x2xf32, #tpu.memory_space<vmem>>) attributes {dimension_semantics = [#tpu.dimension_semantics<parallel>], iteration_bounds = array<i64: 1>, scalar_prefetch = 0 : i64, scratch_operands = 0 : i64, tpu.core_type = #tpu.core_type<tc>, window_params = [{transform_indices = @transform_0, window_bounds = array<i64: 2, 2>}, {transform_indices = @transform_1, window_bounds = array<i64: 6, 2>}]} {
    %c0 = arith.constant 0 : index
    %c0_0 = arith.constant 0 : index
    %0 = vector.load %arg1[%c0, %c0_0] : memref<2x2xf32, #tpu.memory_space<vmem>>, vector<2x2xf32>
    %1 = math.tanh %0 : vector<2x2xf32>
    %2 = tpu.concatenate %1, %1, %1 in 0 : vector<2x2xf32>, vector<2x2xf32>, vector<2x2xf32> -> vector<6x2xf32>
    %c0_1 = arith.constant 0 : index
    %c0_2 = arith.constant 0 : index
    %3 = vector.load %arg2[%c0_1, %c0_2] : memref<6x2xf32, #tpu.memory_space<vmem>>, vector<6x2xf32>
    tpu.vector_store %arg2[%c0_1, %c0_2], %2 {strides = array<i32>} : memref<6x2xf32, #tpu.memory_space<vmem>>, vector<6x2xf32>,
    return
  }
  func.func @transform_0(%arg0: i32) -> (i32, i32) {
    %c0_i32 = arith.constant 0 : i32
    %c0_i32_0 = arith.constant 0 : i32
    return %c0_i32, %arg0 : i32, i32
  }
  func.func @transform_1(%arg0: i32) -> (i32, i32) {
    %c0_i32 = arith.constant 0 : i32
    %c0_i32_0 = arith.constant 0 : i32
    return %c0_i32, %arg0 : i32, i32
  }
}

</mosaic_0001>

<bundles_post_ra>
// kernel: tpu_custom_call.1
= control target key start
LH: loop header
LB: loop body
LE: loop exit
PB: predicated region body
PF: predicated region fallthrough
CT: control target
= control target key end

     0   :  { %6 = vsyncpa [#allocation3], 0  ;;  %s65_s6 = smov [#allocation2]   ;;  %s91_s0 = inlined_call_operand.hbm [shape: f32[2,2], index: 0, kind: input, shape index: {}]   ;;  %s92_s1 = inlined_call_operand.vmem [shape: f32[6,2], index: 1, kind: output, shape index: {}]  }
   0x1   :  { %s13_s7 = sshll.u32 %s65_s6, 4  ;;  %s41_s10 = scalar_lea.hbm %s91_s0, 32  ;;  %s14_s7 = int_to_ptr.vmem [resolvable:$true] %s13_s7 }
   0x2   :  { %p42_p0 = scmp.ne.s32.totalorder %s91_s0, %s41_s10  ;;  %p45_p1 = scmp.lt.u32.totalorder %s41_s10, %s91_s0 }
   0x4   :  { %p47_p2 = pnand %p45_p1, %p42_p0 }
   0x6   :  { %50 = shalt.err (!%p47_p2)
}
   0x7   :  { %s51_s15 = scalar_lea.vmem %s14_s7, 32  ;;  %p56_p4 = scmp.lt.s32.totalorder %s14_s7, %s14_s7 }
   0x8   :  { %p52_p3 = scmp.ne.s32.totalorder %s14_s7, %s51_s15  ;;  %p57_p5 = scmp.lt.s32.totalorder %s51_s15, %s51_s15 }
   0xa   :  { %p58_p6 = por %p57_p5, %p56_p4 }
   0xc   :  { %p59_p7 = pnand %p58_p6, %p52_p3 }
   0xe   :  { %62 = shalt.err (!%p59_p7)
}
   0xf   :  { %16 = dma.hbm_to_vmem [thread:$0]  %s91_s0, 32, %s14_s7, [#allocation3]  }
  0x10   :  { %63 = dma.done.wait [#allocation3], 32  }
  0x11   :  { %64 = vsyncadd [#allocation3], 4294967264  ;;  %v20_v0 = vld [vmem:[#allocation2] sm:$0x3]  ;;  %vm27_vm0 = vcmask 1041408   ;;  %vm29_vm1 = vcmask 1043456  }
  0x12   :  { %39 = vtanh.f32 %v20_v0  ;;  %vm31_vm2 = vcmask 13312  }
  0x1c   :  { %v40_v1 = vpop.eup %39 }
  0x1d   :  { %v23_v2 = vrot.slane %v40_v1, 6  ;;  %v25_v3 = vrot.slane %v40_v1, 4 }
  0x1f   :  { %v28_v4 = vsel %vm27_vm0, %v40_v1, %v23_v2 }
  0x20   :  { %v30_v5 = vsel %vm29_vm1, %v28_v4, %v25_v3 }
  0x21   :  { %32 = vst.msk [vmem:[%s92_s1] sm:$0x3f] %vm31_vm2, %v30_v5 }
  0x22   :  { %37 = vsyncpa [#allocation3], 1 }

</bundles_post_ra>
